<compile_context>
chip_gen: v5e
topology: v5e:2x2
jax: 0.10.0
libtpu: 0.0.40
codegen_flags: <defaults>
</compile_context>

<pallas_src>
import functools

import jax
import jax.numpy as jnp
from jax.experimental import pallas as pl
from jax.experimental.pallas import tpu as pltpu

_LANE = 128


def _round_up(n, m):
    return ((n + m - 1) // m) * m


def _fused_mlp_kernel(*refs, num_layers, out_lo, out_hi, compute_dtype):
    # refs = (x_ref, w0, b0, w1, b1, ..., w_{L-1}, b_{L-1}, o_ref)
    x_ref = refs[0]
    o_ref = refs[-1]
    wb = refs[1:-1]

    h = x_ref[...].astype(compute_dtype)                  # (TILE_B, Din_pad)
    for li in range(num_layers):
        w = wb[2 * li][...].astype(compute_dtype)         # (din_pad, dout_pad)
        b = wb[2 * li + 1][...]                           # (1, dout_pad), f32
        y = jnp.dot(h, w, preferred_element_type=jnp.float32) + b
        if li < num_layers - 1:
            h = jnp.maximum(y, 0.0).astype(compute_dtype)  # ReLU (f32 epilogue, then cast)
        else:
            # MLPModel epilogue: sigmoid(y) * (hi - lo) + lo   (f32, numerically fine)
            y = 1.0 / (1.0 + jnp.exp(-y))
            y = y * (out_hi - out_lo) + out_lo
            o_ref[...] = y.astype(o_ref.dtype)


def mlp_model_forward(x, params, output_range, *, tile_b=256, compute_dtype=jnp.float32):
    """x: (B, ...) flattened to (B, input_dim); params: list of (W (in,out), b (out,))."""
    B = x.shape[0]
    xf = x.reshape(B, -1).astype(jnp.float32)
    din = xf.shape[1]
    lo, hi = float(output_range[0]), float(output_range[1])
    num_layers = len(params)
    dout_final = params[-1][0].shape[1]

    # Lane-dense padding of every feature dim to a multiple of 128 (zeros propagate
    # harmlessly: zero weight cols/rows + zero bias -> padded activations stay 0 thru ReLU).
    dims = [din] + [w.shape[1] for (w, _) in params]
    dims_pad = [_round_up(d, _LANE) for d in dims]

    # Batch tiling: multiple of 8 sublanes; pad B up to a whole number of tiles.
    tile_b = min(tile_b, _round_up(B, 8))
    b_pad = _round_up(B, tile_b)

    xp = jnp.zeros((b_pad, dims_pad[0]), jnp.float32).at[:B, :din].set(xf)

    padded_wb = []
    for li, (w, b) in enumerate(params):
        di, do = w.shape
        dip, dop = dims_pad[li], dims_pad[li + 1]
        wp = jnp.zeros((dip, dop), jnp.float32).at[:di, :do].set(w.astype(jnp.float32))
        bp = jnp.zeros((1, dop), jnp.float32).at[:, :do].set(
            b.astype(jnp.float32).reshape(1, do))
        padded_wb.append((wp, bp))

    grid = (b_pad // tile_b,)
    in_specs = [pl.BlockSpec((tile_b, dims_pad[0]), lambda i: (i, 0))]
    flat_inputs = [xp]
    for wp, bp in padded_wb:
        # Constant index_map -> weights/biases stay resident in VMEM across grid steps.
        in_specs.append(pl.BlockSpec(wp.shape, lambda i: (0, 0)))
        in_specs.append(pl.BlockSpec(bp.shape, lambda i: (0, 0)))
        flat_inputs += [wp, bp]
    out_specs = pl.BlockSpec((tile_b, dims_pad[-1]), lambda i: (i, 0))

    flops = 2 * b_pad * sum(dims_pad[i] * dims_pad[i + 1] for i in range(num_layers))
    transcendentals = b_pad * dims_pad[-1]  # exp inside the sigmoid epilogue
    bytes_accessed = 4 * (xp.size
                          + sum(wp.size + bp.size for wp, bp in padded_wb)
                          + b_pad * dims_pad[-1])

    kernel = functools.partial(
        _fused_mlp_kernel,
        num_layers=num_layers, out_lo=lo, out_hi=hi, compute_dtype=compute_dtype)

    out_pad = pl.pallas_call(
        kernel,
        out_shape=jax.ShapeDtypeStruct((b_pad, dims_pad[-1]), jnp.float32),
        grid=grid,
        in_specs=in_specs,
        out_specs=out_specs,
        compiler_params=pltpu.CompilerParams(
            dimension_semantics=("parallel",)),  # batch rows independent -> megacore on v7x
        cost_estimate=pl.CostEstimate(
            flops=flops, transcendentals=transcendentals, bytes_accessed=bytes_accessed),
    )(*flat_inputs)

    return out_pad[:B, :dout_final]
    # TODO(synk): use_batch_norm=True branch is skipped — the PyTorch code builds a fresh,
    # untrained BatchNorm1d per forward and references fc.out_channels (nonexistent on Linear).


def init_mlp_params(key, input_dim, output_dim, hidden_dims):
    """Deterministic init mimicking torch.nn.Linear default (uniform +-1/sqrt(fan_in)).
    Weights stored pre-transposed as (in, out) so the kernel computes y = x @ W + b."""
    dims = [input_dim] + list(hidden_dims) + [output_dim]
    params = []
    for i in range(len(dims) - 1):
        key, kw, kb = jax.random.split(key, 3)
        fan_in, fan_out = dims[i], dims[i + 1]
        bound = 1.0 / jnp.sqrt(fan_in)
        w = jax.random.uniform(kw, (fan_in, fan_out), jnp.float32, -bound, bound)
        b = jax.random.uniform(kb, (fan_out,), jnp.float32, -bound, bound)
        params.append((w, b))
    return params


if __name__ == "__main__":
    key = jax.random.PRNGKey(0)
    kx, kp = jax.random.split(key)

    # Small shapes consistent with the module: input flattens to input_dim.
    B = 2
    input_shape = (B, 4, 16)          # flattens to input_dim = 64
    input_dim = 4 * 16
    hidden_dims = (32, 32)
    output_dim = 8
    output_range = (-1.0, 2.0)

    x = jax.random.normal(kx, input_shape, dtype=jnp.float32)
    params = init_mlp_params(kp, input_dim, output_dim, hidden_dims)

    out = mlp_model_forward(x, params, output_range)   # f32 matmul for an exact check;
    out = jax.block_until_ready(out)                   # pass compute_dtype=jnp.bfloat16 on v6e/v7x.

    # Pure-JAX reference of the same math (MLPModel.forward).
    h = x.reshape(B, -1)
    for i, (w, b) in enumerate(params):
        h = h @ w + b
        if i < len(params) - 1:
            h = jnp.maximum(h, 0.0)
    ref = jax.nn.sigmoid(h) * (output_range[1] - output_range[0]) + output_range[0]

    assert out.shape == (B, output_dim)
    assert jnp.allclose(out, ref, atol=1e-5, rtol=1e-5)

    print("KERNEL_OK")
</pallas_src>

<mosaic_0001>
module attributes {stable_mosaic.version = 11 : i64} {
  func.func @_fused_mlp_kernel(%arg0: i32, %arg1: memref<8x128xf32, #tpu.memory_space<vmem>>, %arg2: memref<128x128xf32, #tpu.memory_space<vmem>>, %arg3: memref<1x128xf32, #tpu.memory_space<vmem>>, %arg4: memref<128x128xf32, #tpu.memory_space<vmem>>, %arg5: memref<1x128xf32, #tpu.memory_space<vmem>>, %arg6: memref<128x128xf32, #tpu.memory_space<vmem>>, %arg7: memref<1x128xf32, #tpu.memory_space<vmem>>, %arg8: memref<8x128xf32, #tpu.memory_space<vmem>>) attributes {dimension_semantics = [#tpu.dimension_semantics<parallel>], iteration_bounds = array<i64: 1>, scalar_prefetch = 0 : i64, scratch_operands = 0 : i64, tpu.core_type = #tpu.core_type<tc>, window_params = [{transform_indices = @transform_0, window_bounds = array<i64: 8, 128>}, {pipeline_mode = #tpu.pipeline_mode<synchronous>, transform_indices = @transform_1, window_bounds = array<i64: 128, 128>}, {pipeline_mode = #tpu.pipeline_mode<synchronous>, transform_indices = @transform_2, window_bounds = array<i64: 1, 128>}, {pipeline_mode = #tpu.pipeline_mode<synchronous>, transform_indices = @transform_3, window_bounds = array<i64: 128, 128>}, {pipeline_mode = #tpu.pipeline_mode<synchronous>, transform_indices = @transform_4, window_bounds = array<i64: 1, 128>}, {pipeline_mode = #tpu.pipeline_mode<synchronous>, transform_indices = @transform_5, window_bounds = array<i64: 128, 128>}, {pipeline_mode = #tpu.pipeline_mode<synchronous>, transform_indices = @transform_6, window_bounds = array<i64: 1, 128>}, {transform_indices = @transform_7, window_bounds = array<i64: 8, 128>}]} {
    %c0 = arith.constant 0 : index
    %c0_0 = arith.constant 0 : index
    %0 = vector.load %arg1[%c0, %c0_0] : memref<8x128xf32, #tpu.memory_space<vmem>>, vector<8x128xf32>
    %c0_1 = arith.constant 0 : index
    %c0_2 = arith.constant 0 : index
    %1 = vector.load %arg2[%c0_1, %c0_2] : memref<128x128xf32, #tpu.memory_space<vmem>>, vector<128x128xf32>
    %c0_3 = arith.constant 0 : index
    %c0_4 = arith.constant 0 : index
    %2 = vector.load %arg3[%c0_3, %c0_4] : memref<1x128xf32, #tpu.memory_space<vmem>>, vector<1x128xf32>
    %cst = arith.constant dense<0.000000e+00> : vector<8x128xf32>
    %3 = tpu.matmul %0, %1, %cst {dimension_numbers = #tpu.dot_dimension_numbers<[1], [0], [0], [1], [0, 0, 1, 1], [], []>} : vector<8x128xf32>, vector<128x128xf32>, vector<8x128xf32> -> vector<8x128xf32>
    %4 = vector.broadcast %2 : vector<1x128xf32> to vector<8x128xf32>
    %5 = arith.addf %3, %4 : vector<8x128xf32>
    %cst_5 = arith.constant 0.000000e+00 : f32
    %6 = vector.broadcast %cst_5 : f32 to vector<8x128xf32>
    %7 = arith.maximumf %5, %6 : vector<8x128xf32>
    %c0_6 = arith.constant 0 : index
    %c0_7 = arith.constant 0 : index
    %8 = vector.load %arg4[%c0_6, %c0_7] : memref<128x128xf32, #tpu.memory_space<vmem>>, vector<128x128xf32>
    %c0_8 = arith.constant 0 : index
    %c0_9 = arith.constant 0 : index
    %9 = vector.load %arg5[%c0_8, %c0_9] : memref<1x128xf32, #tpu.memory_space<vmem>>, vector<1x128xf32>
    %cst_10 = arith.constant dense<0.000000e+00> : vector<8x128xf32>
    %10 = tpu.matmul %7, %8, %cst_10 {dimension_numbers = #tpu.dot_dimension_numbers<[1], [0], [0], [1], [0, 0, 1, 1], [], []>} : vector<8x128xf32>, vector<128x128xf32>, vector<8x128xf32> -> vector<8x128xf32>
    %11 = vector.broadcast %9 : vector<1x128xf32> to vector<8x128xf32>
    %12 = arith.addf %10, %11 : vector<8x128xf32>
    %cst_11 = arith.constant 0.000000e+00 : f32
    %13 = vector.broadcast %cst_11 : f32 to vector<8x128xf32>
    %14 = arith.maximumf %12, %13 : vector<8x128xf32>
    %c0_12 = arith.constant 0 : index
    %c0_13 = arith.constant 0 : index
    %15 = vector.load %arg6[%c0_12, %c0_13] : memref<128x128xf32, #tpu.memory_space<vmem>>, vector<128x128xf32>
    %c0_14 = arith.constant 0 : index
    %c0_15 = arith.constant 0 : index
    %16 = vector.load %arg7[%c0_14, %c0_15] : memref<1x128xf32, #tpu.memory_space<vmem>>, vector<1x128xf32>
    %cst_16 = arith.constant dense<0.000000e+00> : vector<8x128xf32>
    %17 = tpu.matmul %14, %15, %cst_16 {dimension_numbers = #tpu.dot_dimension_numbers<[1], [0], [0], [1], [0, 0, 1, 1], [], []>} : vector<8x128xf32>, vector<128x128xf32>, vector<8x128xf32> -> vector<8x128xf32>
    %18 = vector.broadcast %16 : vector<1x128xf32> to vector<8x128xf32>
    %19 = arith.addf %17, %18 : vector<8x128xf32>
    %cst_17 = arith.constant 0.000000e+00 : f32
    %20 = vector.broadcast %cst_17 : f32 to vector<8x128xf32>
    %21 = arith.subf %20, %19 : vector<8x128xf32>
    %22 = math.exp %21 : vector<8x128xf32>
    %cst_18 = arith.constant 1.000000e+00 : f32
    %23 = vector.broadcast %cst_18 : f32 to vector<8x128xf32>
    %24 = arith.addf %23, %22 : vector<8x128xf32>
    %cst_19 = arith.constant 1.000000e+00 : f32
    %25 = vector.broadcast %cst_19 : f32 to vector<8x128xf32>
    %26 = arith.divf %25, %24 : vector<8x128xf32>
    %cst_20 = arith.constant 3.000000e+00 : f32
    %27 = vector.broadcast %cst_20 : f32 to vector<8x128xf32>
    %28 = arith.mulf %26, %27 : vector<8x128xf32>
    %cst_21 = arith.constant -1.000000e+00 : f32
    %29 = vector.broadcast %cst_21 : f32 to vector<8x128xf32>
    %30 = arith.addf %28, %29 : vector<8x128xf32>
    %c0_22 = arith.constant 0 : index
    %c0_23 = arith.constant 0 : index
    %31 = vector.load %arg8[%c0_22, %c0_23] : memref<8x128xf32, #tpu.memory_space<vmem>>, vector<8x128xf32>
    tpu.vector_store %arg8[%c0_22, %c0_23], %30 {strides = array<i32>} : memref<8x128xf32, #tpu.memory_space<vmem>>, vector<8x128xf32>,
    return
  }
  func.func @transform_0(%arg0: i32) -> (i32, i32) {
    %c0_i32 = arith.constant 0 : i32
    %c0_i32_0 = arith.constant 0 : i32
    return %arg0, %c0_i32 : i32, i32
  }
  func.func @transform_1(%arg0: i32) -> (i32, i32) {
    %c0_i32 = arith.constant 0 : i32
    %c0_i32_0 = arith.constant 0 : i32
    %c0_i32_1 = arith.constant 0 : i32
    return %c0_i32, %c0_i32_0 : i32, i32
  }
  func.func @transform_2(%arg0: i32) -> (i32, i32) {
    %c0_i32 = arith.constant 0 : i32
    %c0_i32_0 = arith.constant 0 : i32
    %c0_i32_1 = arith.constant 0 : i32
    return %c0_i32, %c0_i32_0 : i32, i32
  }
  func.func @transform_3(%arg0: i32) -> (i32, i32) {
    %c0_i32 = arith.constant 0 : i32
    %c0_i32_0 = arith.constant 0 : i32
    %c0_i32_1 = arith.constant 0 : i32
    return %c0_i32, %c0_i32_0 : i32, i32
  }
  func.func @transform_4(%arg0: i32) -> (i32, i32) {
    %c0_i32 = arith.constant 0 : i32
    %c0_i32_0 = arith.constant 0 : i32
    %c0_i32_1 = arith.constant 0 : i32
    return %c0_i32, %c0_i32_0 : i32, i32
  }
  func.func @transform_5(%arg0: i32) -> (i32, i32) {
    %c0_i32 = arith.constant 0 : i32
    %c0_i32_0 = arith.constant 0 : i32
    %c0_i32_1 = arith.constant 0 : i32
    return %c0_i32, %c0_i32_0 : i32, i32
  }
  func.func @transform_6(%arg0: i32) -> (i32, i32) {
    %c0_i32 = arith.constant 0 : i32
    %c0_i32_0 = arith.constant 0 : i32
    %c0_i32_1 = arith.constant 0 : i32
    return %c0_i32, %c0_i32_0 : i32, i32
  }
  func.func @transform_7(%arg0: i32) -> (i32, i32) {
    %c0_i32 = arith.constant 0 : i32
    %c0_i32_0 = arith.constant 0 : i32
    return %arg0, %c0_i32 : i32, i32
  }
}

</mosaic_0001>

<bundles_post_ra>
// kernel: tpu_custom_call.1
= control target key start
LH: loop header
LB: loop body
LE: loop exit
PB: predicated region body
PF: predicated region fallthrough
CT: control target
= control target key end

     0   :  { %12 = vsyncpa [#allocation3], 0  ;;  %s465_s0 = inlined_call_operand.hbm [shape: f32[8,128], index: 0, kind: input, shape index: {}]   ;;  %s466_s1 = inlined_call_operand.hbm [shape: f32[128,128], index: 1, kind: input, shape index: {}]   ;;  %s467_s2 = inlined_call_operand.vmem [shape: f32[1,128], index: 2, kind: input, shape index: {}]   ;;  %s468_s3 = inlined_call_operand.hbm [shape: f32[128,128], index: 3, kind: input, shape index: {}]   ;;  %s469_s4 = inlined_call_operand.vmem [shape: f32[1,128], index: 4, kind: input, shape index: {}]   ;;  %s470_s5 = inlined_call_operand.hbm [shape: f32[128,128], index: 5, kind: input, shape index: {}]   ;;  %s471_s6 = inlined_call_operand.vmem [shape: f32[1,128], index: 6, kind: input, shape index: {}]   ;;  %s472_s7 = inlined_call_operand.hbm [shape: f32[8,128], index: 7, kind: output, shape index: {}]  }
   0x1   :  { %13 = vsyncpa [#allocation6], 0 }
   0x2   :  { %14 = vsyncpa [#allocation9], 0  ;;  %s31_s26 = sshll.u32 %s466_s1, 4  ;;  %s32_s26 = int_to_ptr.hbm [resolvable:$true] %s31_s26 }
   0x3   :  { %15 = vsyncpa [#allocation4], 0  ;;  %s394_s27 = smov [#allocation5]   ;;  %s21_s8 = sshll.u32 %s465_s0, 4  ;;  %s22_s8 = int_to_ptr.hbm [resolvable:$true] %s21_s8 }
   0x4   :  { %s33_s28 = sshll.u32 %s394_s27, 4  ;;  %s395_s9 = smov 128   ;;  %s34_s28 = int_to_ptr.vmem [resolvable:$true] %s33_s28 }
   0x5   :  { %s396_s10 = smov 8   ;;  %s397_s11 = smov [#allocation2]  }
   0x6   :  { %39 = dma.hbm_to_vmem [thread:$0]  %s32_s26, 2048, %s34_s28, [#allocation6], %s395_s9, %s395_s9, %s396_s10  }
   0x7   :  { %s23_s12 = sshll.u32 %s397_s11, 4  ;;  %s46_s15 = sshll.u32 %s468_s3, 4  ;;  %s24_s12 = int_to_ptr.vmem [resolvable:$true] %s23_s12  ;;  %s47_s15 = int_to_ptr.hbm [resolvable:$true] %s46_s15 }
   0x8   :  { %26 = dma.hbm_to_vmem [thread:$0]  %s22_s8, 128, %s24_s12, [#allocation3]  }
   0x9   :  { %s61_s17 = sshll.u32 %s470_s5, 4  ;;  %s398_s18 = smov [#allocation7]   ;;  %s62_s17 = int_to_ptr.hbm [resolvable:$true] %s61_s17 }
   0xa   :  { %s48_s19 = sshll.u32 %s398_s18, 4  ;;  %s399_s0 = smov [#allocation8]   ;;  %s49_s19 = int_to_ptr.vmem [resolvable:$true] %s48_s19 }
   0xb   :  { %54 = dma.hbm_to_vmem [thread:$0]  %s47_s15, 2048, %s49_s19, [#allocation6], %s395_s9, %s395_s9, %s396_s10  }
   0xc   :  { %s63_s20 = sshll.u32 %s399_s0, 4  ;;  %s64_s20 = int_to_ptr.vmem [resolvable:$true] %s63_s20 }
   0xd   :  { %69 = dma.hbm_to_vmem [thread:$0]  %s62_s17, 2048, %s64_s20, [#allocation9], %s395_s9, %s395_s9, %s396_s10  }
   0xe   :  { %386 = dma.done.wait [#allocation3], 128  }
   0xf   :  { %387 = vsyncadd [#allocation3], 4294967168 }
  0x10   :  { %388 = dma.done.wait [#allocation6], 4096  }
  0x11   :  { %389 = vsyncadd [#allocation6], 4294963200 }
  0x12   :  { %390 = dma.done.wait [#allocation9], 2048  }
  0x13   :  { %391 = vsyncadd [#allocation9], 4294965248  ;;  %v104_v0 = vld [vmem:[#allocation5 + $0x78] sm:$0xff]  ;;  %v103_v1 = vld [vmem:[#allocation5 + $0x70] sm:$0xff]  ;;  %s240_s26 = sshll.u32 %s472_s7, 4  ;;  %s241_s26 = int_to_ptr.hbm [resolvable:$true] %s240_s26 }
  0x14   :  { %109 = vmatpush.msra.mxu0 %v104_v0  ;;  %v102_v2 = vld [vmem:[#allocation5 + $0x68] sm:$0xff]  ;;  %v101_v3 = vld [vmem:[#allocation5 + $0x60] sm:$0xff]  ;;  %v145_v4 = vld [vmem:[#allocation7 + $0x78] sm:$0xff] }
  0x15   :  { %v100_v5 = vld [vmem:[#allocation5 + $0x58] sm:$0xff]  ;;  %150 = vmatpush.msra.mxu1 %v145_v4  ;;  %v144_v6 = vld [vmem:[#allocation7 + $0x70] sm:$0xff]  ;;  %v143_v7 = vld [vmem:[#allocation7 + $0x68] sm:$0xff] }
  0x16   :  { %110 = vmatpush.msra.mxu0 %v103_v1  ;;  %v99_v8 = vld [vmem:[#allocation5 + $0x50] sm:$0xff]  ;;  %v142_v9 = vld [vmem:[#allocation7 + $0x60] sm:$0xff]  ;;  %v98_v10 = vld [vmem:[#allocation5 + $0x48] sm:$0xff] }
  0x17   :  { %151 = vmatpush.msra.mxu1 %v144_v6  ;;  %v141_v11 = vld [vmem:[#allocation7 + $0x58] sm:$0xff]  ;;  %v97_v12 = vld [vmem:[#allocation5 + $0x40] sm:$0xff]  ;;  %v140_v13 = vld [vmem:[#allocation7 + $0x50] sm:$0xff] }
  0x18   :  { %111 = vmatpush.msra.mxu0 %v102_v2  ;;  %v96_v14 = vld [vmem:[#allocation5 + $0x38] sm:$0xff]  ;;  %v139_v15 = vld [vmem:[#allocation7 + $0x48] sm:$0xff]  ;;  %v95_v16 = vld [vmem:[#allocation5 + $0x30] sm:$0xff] }
  0x19   :  { %152 = vmatpush.msra.mxu1 %v143_v7  ;;  %v138_v17 = vld [vmem:[#allocation7 + $0x40] sm:$0xff]  ;;  %v94_v18 = vld [vmem:[#allocation5 + $0x28] sm:$0xff]  ;;  %v137_v19 = vld [vmem:[#allocation7 + $0x38] sm:$0xff] }
  0x1a   :  { %112 = vmatpush.msra.mxu0 %v101_v3  ;;  %v93_v20 = vld [vmem:[#allocation5 + $0x20] sm:$0xff]  ;;  %v136_v21 = vld [vmem:[#allocation7 + $0x30] sm:$0xff]  ;;  %v92_v22 = vld [vmem:[#allocation5 + $0x18] sm:$0xff] }
  0x1b   :  { %153 = vmatpush.msra.mxu1 %v142_v9  ;;  %v135_v23 = vld [vmem:[#allocation7 + $0x28] sm:$0xff]  ;;  %v91_v24 = vld [vmem:[#allocation5 + $0x10] sm:$0xff]  ;;  %v134_v25 = vld [vmem:[#allocation7 + $0x20] sm:$0xff] }
  0x1c   :  { %113 = vmatpush.msra.mxu0 %v100_v5  ;;  %v90_v26 = vld [vmem:[#allocation5 + $0x8] sm:$0xff]  ;;  %v133_v27 = vld [vmem:[#allocation7 + $0x18] sm:$0xff]  ;;  %v89_v28 = vld [vmem:[#allocation5] sm:$0xff] }
  0x1d   :  { %154 = vmatpush.msra.mxu1 %v141_v11  ;;  %v88_v29 = vld [vmem:[#allocation2] sm:$0xff]  ;;  %v132_v30 = vld [vmem:[#allocation7 + $0x10] sm:$0xff]  ;;  %v131_v31 = vld [vmem:[#allocation7 + $0x8] sm:$0xff] }
  0x1e   :  { %114 = vmatpush.msra.mxu0 %v99_v8  ;;  %v130_v32 = vld [vmem:[#allocation7] sm:$0xff]  ;;  %v186_v33 = vld [vmem:[#allocation8 + $0x78] sm:$0xff]  ;;  %v185_v34 = vld [vmem:[#allocation8 + $0x70] sm:$0xff] }
  0x1f   :  { %155 = vmatpush.msra.mxu1 %v140_v13  ;;  %191 = vmatpush.msra.mxu2 %v186_v33  ;;  %v184_v35 = vld [vmem:[#allocation8 + $0x68] sm:$0xff]  ;;  %v183_v36 = vld [vmem:[#allocation8 + $0x60] sm:$0xff]  ;;  %v182_v37 = vld [vmem:[#allocation8 + $0x58] sm:$0xff] }
  0x20   :  { %115 = vmatpush.msra.mxu0 %v98_v10  ;;  %v181_v38 = vld [vmem:[#allocation8 + $0x50] sm:$0xff]  ;;  %v180_v39 = vld [vmem:[#allocation8 + $0x48] sm:$0xff]  ;;  %v179_v40 = vld [vmem:[#allocation8 + $0x40] sm:$0xff] }
  0x21   :  { %156 = vmatpush.msra.mxu1 %v139_v15  ;;  %192 = vmatpush.msra.mxu2 %v185_v34  ;;  %v178_v41 = vld [vmem:[#allocation8 + $0x38] sm:$0xff]  ;;  %v177_v42 = vld [vmem:[#allocation8 + $0x30] sm:$0xff]  ;;  %v176_v43 = vld [vmem:[#allocation8 + $0x28] sm:$0xff] }
  0x22   :  { %116 = vmatpush.msra.mxu0 %v97_v12  ;;  %v175_v44 = vld [vmem:[#allocation8 + $0x20] sm:$0xff]  ;;  %v174_v45 = vld [vmem:[#allocation8 + $0x18] sm:$0xff]  ;;  %v173_v50 = vld [vmem:[#allocation8 + $0x10] sm:$0xff] }
  0x23   :  { %157 = vmatpush.msra.mxu1 %v138_v17  ;;  %193 = vmatpush.msra.mxu2 %v184_v35  ;;  %v259_v46 = vld [vmem:[%s467_s2] ss:$0 sm:$0xff]  ;;  %v172_v51 = vld [vmem:[#allocation8 + $0x8] sm:$0xff]  ;;  %v171_v52 = vld [vmem:[#allocation8] sm:$0xff] }
  0x24   :  { %117 = vmatpush.msra.mxu0 %v96_v14  ;;  %v260_v53 = vld [vmem:[%s469_s4] ss:$0 sm:$0xff]  ;;  %s400_s4 = smov [#allocation10]  }
  0x25   :  { %158 = vmatpush.msra.mxu1 %v137_v19  ;;  %194 = vmatpush.msra.mxu2 %v183_v36  ;;  %v261_v57 = vld [vmem:[%s471_s6] ss:$0 sm:$0xff]  ;;  %s238_s6 = sshll.u32 %s400_s4, 4  ;;  %s239_s6 = int_to_ptr.vmem [resolvable:$true] %s238_s6 }
  0x26   :  { %118 = vmatpush.msra.mxu0 %v95_v16 }
  0x27   :  { %159 = vmatpush.msra.mxu1 %v136_v21  ;;  %195 = vmatpush.msra.mxu2 %v182_v37 }
  0x28   :  { %119 = vmatpush.msra.mxu0 %v94_v18 }
  0x29   :  { %160 = vmatpush.msra.mxu1 %v135_v23  ;;  %196 = vmatpush.msra.mxu2 %v181_v38 }
  0x2a   :  { %120 = vmatpush.msra.mxu0 %v93_v20 }
  0x2b   :  { %161 = vmatpush.msra.mxu1 %v134_v25  ;;  %197 = vmatpush.msra.mxu2 %v180_v39 }
  0x2c   :  { %121 = vmatpush.msra.mxu0 %v92_v22 }
  0x2d   :  { %162 = vmatpush.msra.mxu1 %v133_v27  ;;  %198 = vmatpush.msra.mxu2 %v179_v40 }
  0x2e   :  { %122 = vmatpush.msra.mxu0 %v91_v24 }
  0x2f   :  { %163 = vmatpush.msra.mxu1 %v132_v30  ;;  %199 = vmatpush.msra.mxu2 %v178_v41 }
  0x30   :  { %123 = vmatpush.msra.mxu0 %v90_v26 }
  0x31   :  { %164 = vmatpush.msra.mxu1 %v131_v31  ;;  %200 = vmatpush.msra.mxu2 %v177_v42 }
  0x32   :  { %124 = vmatpush.msra.mxu0 %v89_v28 }
  0x33   :  { %125 = vmatmul.f32.vlgmr.msra.gmra.mxu0 %v88_v29  ;;  %165 = vmatpush.msra.mxu1 %v130_v32 }
  0x34   :  { %201 = vmatpush.msra.mxu2 %v176_v43 }
  0x36   :  { %202 = vmatpush.msra.mxu2 %v175_v44 }
  0x38   :  { %203 = vmatpush.msra.mxu2 %v174_v45 }
  0x3a   :  { %204 = vmatpush.msra.mxu2 %v173_v50 }
  0x3c   :  { %205 = vmatpush.msra.mxu2 %v172_v51 }
  0x3e   :  { %206 = vmatpush.msra.mxu2 %v171_v52 }
  0xb0   :  { %v126_v47 = vpop.f32.mrf.mxu0 }
  0xb1   :  { %v127_v48 = vadd.f32 %v259_v46, %v126_v47 }
  0xb3   :  { %v129_v49 = vmax.f32 %v127_v48, 0.0 }
  0xb5   :  { %166 = vmatmul.f32.vlgmr.msra.gmra.mxu1 %v129_v49 }
 0x132   :  { %v167_v54 = vpop.f32.mrf.mxu1 }
 0x133   :  { %v168_v55 = vadd.f32 %v260_v53, %v167_v54 }
 0x135   :  { %v170_v56 = vmax.f32 %v168_v55, 0.0 }
 0x137   :  { %207 = vmatmul.f32.vlgmr.msra.gmra.mxu2 %v170_v56 }
 0x1ba   :  { %v208_v58 = vpop.f32.mrf.mxu2 }
 0x1bb   :  { %v209_v59 = vadd.f32 %v261_v57, %v208_v58 }
 0x1bd   :  { %v211_v60 = vsub.f32 0.0, %v209_v59 }
 0x1bf   :  { %v212_v61 = vmul.f32 1.442695, %v211_v60 }
 0x1c1   :  { %262 = vpow2.f32 %v212_v61 }
 0x1c7   :  { %v263_v62 = vpop.eup %262 }
 0x1c8   :  { %v214_v63 = vadd.f32 1.0, %v263_v62 }
 0x1ca   :  { %264 = vrcp.f32 %v214_v63  ;;  %v226_v3 = vand.u32 2147483648, %v214_v63  ;;  %v224_v5 = vand.u32 2147483647, %v214_v63  ;;  %vm220_vm1 = vweird.f32 %v214_v63 }
 0x1cc   :  { %v227_v7 = vor.u32 1.1754944e-38, %v226_v3  ;;  %vm225_vm3 = vcmp.eq.f32.partialorder %v224_v5, 8.507059e+37 }
 0x1d0   :  { %v265_v0 = vpop.eup %264 }
 0x1d1   :  { %v216_v1 = vmul.f32 %v265_v0, %v214_v63  ;;  %vm221_vm0 = vweird.f32 %v265_v0 }
 0x1d2   :  { %vm222_vm2 = vmor %vm220_vm1, %vm221_vm0 }
 0x1d3   :  { %v217_v2 = vsub.f32 1.0, %v216_v1 }
 0x1d5   :  { %v218_v4 = vmul.f32 %v265_v0, %v217_v2 }
 0x1d7   :  { %v219_v6 = vadd.f32 %v265_v0, %v218_v4 }
 0x1d9   :  { %v223_v8 = vsel %vm222_vm2, %v265_v0, %v219_v6 }
 0x1da   :  { %v228_v9 = vsel %vm225_vm3, %v227_v7, %v223_v8 }
 0x1db   :  { %v230_v10 = vmul.f32 3.0, %v228_v9 }
 0x1dd   :  { %v231_v11 = vadd.f32 -1.0, %v230_v10 }
 0x1df   :  { %232 = vst [vmem:[#allocation10] sm:$0xff] %v231_v11 }
 0x1e0   :  { %243 = dma.vmem_to_hbm [thread:$0]  %s239_s6, 128, %s241_s26, [#allocation4]  }
 0x1e1   :  { %392 = dma.done.wait [#allocation4], 128  }
 0x1e2   :  { %393 = vsyncadd [#allocation4], 4294967168 }
 0x1e3   :  { %248 = vsyncpa [#allocation3], 1 }
 0x1e4   :  { %249 = vsyncpa [#allocation6], 1 }
 0x1e5   :  { %250 = vsyncpa [#allocation9], 1 }
 0x1e6   :  { %251 = vsyncpa [#allocation4], 1 }

</bundles_post_ra>
